<compile_context>
chip_gen: v7x
topology: tpu7x:2x2x1
jax: 0.10.0
libtpu: 0.0.40
codegen_flags: <defaults>
</compile_context>

<pallas_src>
import functools

import jax
import jax.numpy as jnp
from jax.experimental import pallas as pl
from jax.experimental.pallas import tpu as pltpu

_LANE = 128                              # lane width
_SUB_F32 = 8                             # f32 sublane tile (accumulator rows)
_TARGET_BLOCK_BYTES = 4 * 1024 * 1024    # per input per pipeline buffer


def _sublane_tile(dtype):
    # Sub-32-bit dtypes pack along sublanes: f32 -> 8, bf16 -> 16, int8 -> 32.
    return 8 * max(1, 4 // jnp.dtype(dtype).itemsize)


def _num_partial_splits():
    """Independent partial sums: 2 on megacore chips (2 TCs), else 1."""
    try:
        kind = jax.devices()[0].device_kind.lower()
    except Exception:
        return 1
    return 2 if any(tag in kind for tag in ("v7", "v5p", "v4")) else 1


def _l1_kernel(scale, m_rows, block_rows, n_inner, n_blocks, needs_tail_mask,
               o_ref, t_ref, out_ref, acc_ref):
    """Accumulate |o - t| into a single (8, 128) f32 VMEM accumulator.

    Grid is (n_outer, n_inner): outer axis = independent partial sums
    (parallel / megacore), inner axis = sequential reduction (arbitrary).
    The scaled partial sum for outer index i is written on the last inner step.
    """
    i = pl.program_id(0)
    j = pl.program_id(1)

    @pl.when(j == 0)
    def _():
        acc_ref[...] = jnp.zeros_like(acc_ref)

    def folded_abs_diff(mask_rows):
        # Upcast in-kernel so bf16/int8 inputs stream from HBM at native width.
        diff = jnp.abs(o_ref[...].astype(jnp.float32) -
                       t_ref[...].astype(jnp.float32))
        if mask_rows:
            # Zero rows past the true row count (partial tail block, or a
            # clamped duplicate block from the rectangularized 2-D grid).
            blk = i * n_inner + j
            row_ids = (jax.lax.broadcasted_iota(jnp.int32, (block_rows, 1), 0)
                       + blk * block_rows)
            diff = jnp.where(row_ids < m_rows, diff, 0.0)
        # Fold the block into one (8, 128) tile.  The reshape regroups whole
        # (8, 128) sublane tiles, so the reduction stays in vregs (pure VPU
        # adds, no VMEM round trip of a block-shaped accumulator).
        return jnp.sum(diff.reshape(block_rows // _SUB_F32, _SUB_F32, _LANE),
                       axis=0)

    if needs_tail_mask:
        # Only the last real block (and clamped duplicates) can contain
        # invalid rows; keep the steady-state path mask-free.
        is_tail = (i * n_inner + j) >= (n_blocks - 1)

        @pl.when(jnp.logical_not(is_tail))
        def _():
            acc_ref[...] += folded_abs_diff(False)

        @pl.when(is_tail)
        def _():
            acc_ref[...] += folded_abs_diff(True)
    else:
        acc_ref[...] += folded_abs_diff(False)

    @pl.when(j == pl.num_programs(1) - 1)
    def _():
        # Single cross-lane reduce + scale, epilogue only.  Running sums stay
        # in f32; for extremely large tensors with large magnitudes this loses
        # a little precision vs. a pairwise sum — fine for a loss value.
        out_ref[0, 0] = jnp.sum(acc_ref[...]) * jnp.float32(scale)


def l1_loss(output, target, mean=True, block_rows=None, num_splits=None):
    assert output.shape == target.shape, "output/target shape mismatch"
    batch_size = output.shape[0]
    total_elems = output.size

    # Normalization is shape-static (mean -> 1/N, else -> 1/batch).
    scale = (1.0 / total_elems) if mean else (1.0 / batch_size)

    # Flatten in native dtype (free: JAX arrays are contiguous at op
    # boundaries, so reshape is metadata-only).
    o_flat = output.reshape(-1)
    t_flat = target.reshape(-1)

    sub_tile = max(_sublane_tile(output.dtype), _sublane_tile(target.dtype))
    max_itemsize = max(jnp.dtype(output.dtype).itemsize,
                       jnp.dtype(target.dtype).itemsize)

    m_rows = total_elems // _LANE           # lane-aligned rows for the kernel
    kernel_elems = m_rows * _LANE

    if m_rows < sub_tile:
        # Tiny input: not worth a kernel launch.
        diff = jnp.abs(o_flat.astype(jnp.float32) - t_flat.astype(jnp.float32))
        return jnp.sum(diff) * jnp.float32(scale)

    # Lane tail (< 128 elems): tiny jnp expression in the wrapper instead of a
    # full-array jnp.pad copy in HBM.
    has_tail = kernel_elems < total_elems
    if has_tail:
        tail_sum = jnp.sum(
            jnp.abs(o_flat[kernel_elems:].astype(jnp.float32) -
                    t_flat[kernel_elems:].astype(jnp.float32)))
        # NOTE: this prefix slice may materialize a copy, but it only triggers
        # for lane-unaligned sizes (total_elems % 128 != 0); the common
        # lane-aligned path below is copy-free.
        o_flat = o_flat[:kernel_elems]
        t_flat = t_flat[:kernel_elems]

    o2d = o_flat.reshape(m_rows, _LANE)
    t2d = t_flat.reshape(m_rows, _LANE)

    # Block size by bytes (not rows): ~4 MiB per input per step for any dtype,
    # rounded to the dtype's sublane tile.
    if block_rows is None:
        block_rows = _TARGET_BLOCK_BYTES // (_LANE * max_itemsize)
    block_rows = max(sub_tile, (block_rows // sub_tile) * sub_tile)
    block_rows = min(block_rows, (m_rows // sub_tile) * sub_tile)

    n_blocks = pl.cdiv(m_rows, block_rows)
    if num_splits is None:
        num_splits = _num_partial_splits()   # 2 only on megacore chips
    n_outer = max(1, min(num_splits, n_blocks))   # partial sums / TC shards
    n_inner = pl.cdiv(n_blocks, n_outer)          # sequential steps per shard

    # Row mask needed only if the tail block is partial or the rectangular
    # (n_outer x n_inner) grid over-covers the true block count; even then it
    # is evaluated only on the tail/duplicate steps (pl.when in the kernel).
    needs_tail_mask = (m_rows % block_rows != 0) or (n_outer * n_inner != n_blocks)

    def in_index_map(i, j):
        # Clamp so DMAs never run past the array; clamped duplicate blocks
        # contribute zero via the in-kernel tail mask.
        blk = jnp.minimum(i * n_inner + j, n_blocks - 1)
        return (blk, 0)

    kernel = functools.partial(
        _l1_kernel, scale, m_rows, block_rows, n_inner, n_blocks,
        needs_tail_mask)

    partials = pl.pallas_call(
        kernel,
        out_shape=jax.ShapeDtypeStruct((n_outer, 1), jnp.float32),
        grid=(n_outer, n_inner),
        in_specs=[
            pl.BlockSpec((block_rows, _LANE), in_index_map),
            pl.BlockSpec((block_rows, _LANE), in_index_map),
        ],
        out_specs=pl.BlockSpec((1, 1), lambda i, j: (i, 0),
                               memory_space=pltpu.SMEM),
        scratch_shapes=[pltpu.VMEM((_SUB_F32, _LANE), jnp.float32)],
        compiler_params=pltpu.CompilerParams(
            dimension_semantics=("parallel", "arbitrary"),
            vmem_limit_bytes=32 * 1024 * 1024,
        ),
    )(o2d, t2d)

    # <=2 scaled partials; summing them reproduces scale * sum(|o - t|).
    result = jnp.sum(partials)
    if has_tail:
        result = result + tail_sum * jnp.float32(scale)
    return result


def _l1_ref(output, target, mean=True):
    loss_map = jnp.abs(output.astype(jnp.float32) - target.astype(jnp.float32))
    if mean:
        return loss_map.mean()
    return loss_map.sum() / output.shape[0]


if __name__ == "__main__":
    key = jax.random.PRNGKey(0)
    k1, k2, k3, k4 = jax.random.split(key, 4)

    # Small shapes consistent with a dense prediction / flow-style loss map.
    x_shape = (2, 4, 16, 16)  # (B, C, H, W)
    output = jax.random.normal(k1, x_shape, dtype=jnp.float32)
    target = jax.random.normal(k2, x_shape, dtype=jnp.float32)

    # mean=True path (default of the PyTorch module).
    loss_mean = jax.block_until_ready(l1_loss(output, target, mean=True))
    ref_mean = _l1_ref(output, target, mean=True)
    assert jnp.allclose(loss_mean, ref_mean, rtol=1e-5, atol=1e-6), (
        loss_mean, ref_mean)

    # mean=False path (sum / batch_size, matching the module).
    loss_sum = jax.block_until_ready(l1_loss(output, target, mean=False))
    ref_sum = _l1_ref(output, target, mean=False)
    assert jnp.allclose(loss_sum, ref_sum, rtol=1e-5, atol=1e-5), (
        loss_sum, ref_sum)

    # bf16 inputs: exercises dtype-aware (16-row sublane tile) block sizing
    # and in-kernel upcast.
    out_bf = output.astype(jnp.bfloat16)
    tgt_bf = target.astype(jnp.bfloat16)
    loss_bf = jax.block_until_ready(l1_loss(out_bf, tgt_bf, mean=True))
    ref_bf = _l1_ref(out_bf, tgt_bf, mean=True)
    assert jnp.allclose(loss_bf, ref_bf, rtol=1e-5, atol=1e-6), (
        loss_bf, ref_bf)

    # Lane-unaligned size + multi-block + tail-mask + forced 2-way split
    # (the megacore code path), with a tiny block override.
    y_shape = (2, 3, 15, 16)  # 1440 elems -> 11 aligned rows + 32-elem tail
    out2 = jax.random.normal(k3, y_shape, dtype=jnp.float32)
    tgt2 = jax.random.normal(k4, y_shape, dtype=jnp.float32)
    loss2 = jax.block_until_ready(
        l1_loss(out2, tgt2, mean=True, block_rows=8, num_splits=2))
    ref2 = _l1_ref(out2, tgt2, mean=True)
    assert jnp.allclose(loss2, ref2, rtol=1e-5, atol=1e-6), (loss2, ref2)

    # Multi-block, exactly-covering (mask-free) path with auto split count.
    z_shape = (2, 4, 32, 32)  # 8192 elems -> 64 rows
    out3 = jax.random.normal(k1, z_shape, dtype=jnp.float32)
    tgt3 = jax.random.normal(k2, z_shape, dtype=jnp.float32)
    loss3 = jax.block_until_ready(
        l1_loss(out3, tgt3, mean=True, block_rows=16))
    ref3 = _l1_ref(out3, tgt3, mean=True)
    assert jnp.allclose(loss3, ref3, rtol=1e-5, atol=1e-6), (loss3, ref3)

    print("KERNEL_OK")
</pallas_src>

<mosaic_0001>
module attributes {stable_mosaic.version = 11 : i64} {
  func.func @_l1_kernel(%arg0: i32, %arg1: i32, %arg2: memref<16x128xf32, #tpu.memory_space<vmem>>, %arg3: memref<16x128xf32, #tpu.memory_space<vmem>>, %arg4: memref<1x1xf32, #tpu.memory_space<smem>>, %arg5: memref<8x128xf32, #tpu.memory_space<vmem>>) attributes {dimension_semantics = [#tpu.dimension_semantics<parallel>, #tpu.dimension_semantics<arbitrary>], iteration_bounds = array<i64: 1, 1>, scalar_prefetch = 0 : i64, scratch_operands = 1 : i64, tpu.core_type = #tpu.core_type<tc>, window_params = [{transform_indices = @transform_0, window_bounds = array<i64: 16, 128>}, {transform_indices = @transform_1, window_bounds = array<i64: 16, 128>}, {transform_indices = @transform_2, window_bounds = array<i64: 1, 1>}]} {
    %c0_i32 = arith.constant 0 : i32
    %0 = arith.cmpi eq, %arg1, %c0_i32 : i32
    %1 = arith.extui %0 : i1 to i32
    %c0_i32_0 = arith.constant 0 : i32
    %2 = arith.cmpi ne, %1, %c0_i32_0 : i32
    scf.if %2 {
      %cst_10 = arith.constant 0.000000e+00 : f32
      %15 = vector.broadcast %cst_10 : f32 to vector<8x128xf32>
      %c0_11 = arith.constant 0 : index
      %c0_12 = arith.constant 0 : index
      %16 = vector.load %arg5[%c0_11, %c0_12] : memref<8x128xf32, #tpu.memory_space<vmem>>, vector<8x128xf32>
      tpu.vector_store %arg5[%c0_11, %c0_12], %15 {strides = array<i32>} : memref<8x128xf32, #tpu.memory_space<vmem>>, vector<8x128xf32>,
    } else {
    }
    %c0 = arith.constant 0 : index
    %c0_1 = arith.constant 0 : index
    %3 = vector.load %arg5[%c0, %c0_1] : memref<8x128xf32, #tpu.memory_space<vmem>>, vector<8x128xf32>
    %c0_2 = arith.constant 0 : index
    %c0_3 = arith.constant 0 : index
    %4 = vector.load %arg2[%c0_2, %c0_3] : memref<16x128xf32, #tpu.memory_space<vmem>>, vector<16x128xf32>
    %c0_4 = arith.constant 0 : index
    %c0_5 = arith.constant 0 : index
    %5 = vector.load %arg3[%c0_4, %c0_5] : memref<16x128xf32, #tpu.memory_space<vmem>>, vector<16x128xf32>
    %6 = arith.subf %4, %5 : vector<16x128xf32>
    %7 = math.absf %6 : vector<16x128xf32>
    %8 = vector.shape_cast %7 : vector<16x128xf32> to vector<2x8x128xf32>
    %cst = arith.constant dense<0.000000e+00> : vector<8x128xf32>
    %9 = vector.multi_reduction <add>, %8, %cst [0] : vector<2x8x128xf32> to vector<8x128xf32>
    %10 = arith.addf %3, %9 : vector<8x128xf32>
    %c0_6 = arith.constant 0 : index
    %c0_7 = arith.constant 0 : index
    %11 = vector.load %arg5[%c0_6, %c0_7] : memref<8x128xf32, #tpu.memory_space<vmem>>, vector<8x128xf32>
    tpu.vector_store %arg5[%c0_6, %c0_7], %10 {strides = array<i32>} : memref<8x128xf32, #tpu.memory_space<vmem>>, vector<8x128xf32>,
    %c0_i32_8 = arith.constant 0 : i32
    %12 = arith.cmpi eq, %arg1, %c0_i32_8 : i32
    %13 = arith.extui %12 : i1 to i32
    %c0_i32_9 = arith.constant 0 : i32
    %14 = arith.cmpi ne, %13, %c0_i32_9 : i32
    scf.if %14 {
      %c0_10 = arith.constant 0 : index
      %c0_11 = arith.constant 0 : index
      %15 = vector.load %arg5[%c0_10, %c0_11] : memref<8x128xf32, #tpu.memory_space<vmem>>, vector<8x128xf32>
      %16 = vector.shape_cast %15 : vector<8x128xf32> to vector<1x8x128xf32>
      %cst_12 = arith.constant dense<0.000000e+00> : vector<1xf32>
      %17 = vector.multi_reduction <add>, %16, %cst_12 [1, 2] : vector<1x8x128xf32> to vector<1xf32>
      %18 = vector.shape_cast %17 : vector<1xf32> to vector<1x1x1xf32>
      %19 = vector.extract %18[0, 0, 0] : f32 from vector<1x1x1xf32>
      %cst_13 = arith.constant 4.8828125E-4 : f32
      %20 = arith.mulf %19, %cst_13 : f32
      %c0_14 = arith.constant 0 : index
      %c0_15 = arith.constant 0 : index
      %21 = memref.load %arg4[%c0_14, %c0_15] : memref<1x1xf32, #tpu.memory_space<smem>>
      memref.store %20, %arg4[%c0_14, %c0_15] : memref<1x1xf32, #tpu.memory_space<smem>>
    } else {
    }
    return
  }
  func.func @transform_0(%arg0: i32, %arg1: i32) -> (i32, i32) {
    %c1_i32 = arith.constant 1 : i32
    %0 = arith.muli %arg0, %c1_i32 : i32
    %1 = arith.addi %0, %arg1 : i32
    %c0_i32 = arith.constant 0 : i32
    %2 = arith.minsi %1, %c0_i32 : i32
    %c0_i32_0 = arith.constant 0 : i32
    %c0_i32_1 = arith.constant 0 : i32
    return %2, %c0_i32_0 : i32, i32
  }
  func.func @transform_1(%arg0: i32, %arg1: i32) -> (i32, i32) {
    %c1_i32 = arith.constant 1 : i32
    %0 = arith.muli %arg0, %c1_i32 : i32
    %1 = arith.addi %0, %arg1 : i32
    %c0_i32 = arith.constant 0 : i32
    %2 = arith.minsi %1, %c0_i32 : i32
    %c0_i32_0 = arith.constant 0 : i32
    %c0_i32_1 = arith.constant 0 : i32
    return %2, %c0_i32_0 : i32, i32
  }
  func.func @transform_2(%arg0: i32, %arg1: i32) -> (i32, i32) {
    %c0_i32 = arith.constant 0 : i32
    %c0_i32_0 = arith.constant 0 : i32
    return %arg0, %c0_i32 : i32, i32
  }
}

</mosaic_0001>

<bundles_post_ra>
// kernel: tpu_custom_call.1
= control target key start
LH: loop header
LB: loop body
LE: loop exit
PB: predicated region body
PF: predicated region fallthrough
CT: control target
= control target key end

     0   :  { %7 = vsyncpa [#allocation4], 0  ;;  %s235_s0 = inlined_call_operand.hbm [shape: f32[16,128], index: 0, kind: input, shape index: {}]   ;;  %s236_s1 = inlined_call_operand.hbm [shape: f32[16,128], index: 1, kind: input, shape index: {}]   ;;  %s237_s2 = inlined_call_operand.hbm [shape: f32[1,1], index: 2, kind: output, shape index: {}]  }
   0x1   :  { %8 = vsyncpa [#allocation7], 0 }
   0x2   :  { %9 = vsyncpa [#allocation5], 0  ;;  %s179_s9 = smov [#allocation3]   ;;  %s119_s13 = scalar_lea.hbm %s235_s0, 256 }
   0x3   :  { %s21_s10 = sshll.u32 %s179_s9, 4  ;;  %p120_p0 = scmp.ne.s32.totalorder %s235_s0, %s119_s13  ;;  %s22_s10 = int_to_ptr.vmem [resolvable:$true] %s21_s10 }
   0x4   :  { %p123_p1 = scmp.lt.u32.totalorder %s119_s13, %s235_s0 }
   0x6   :  { %p125_p2 = pnand %p123_p1, %p120_p0 }
   0x8   :  { %128 = shalt.err (!%p125_p2)
}
   0x9   :  { %s129_s18 = scalar_lea.vmem %s22_s10, 256  ;;  %p134_p4 = scmp.lt.s32.totalorder %s22_s10, %s22_s10 }
   0xa   :  { %p130_p3 = scmp.ne.s32.totalorder %s22_s10, %s129_s18  ;;  %p135_p5 = scmp.lt.s32.totalorder %s129_s18, %s129_s18 }
   0xc   :  { %p136_p6 = por %p135_p5, %p134_p4 }
   0xe   :  { %p137_p7 = pnand %p136_p6, %p130_p3 }
  0x10   :  { %140 = shalt.err (!%p137_p7)
}
  0x11   :  { %s180_s19 = smov 128   ;;  %s181_s20 = smov 8  }
  0x12   :  { %27 = dma.hbm_to_vmem [thread:$0]  %s235_s0, 256, %s22_s10, [#allocation4], %s180_s19, %s180_s19, %s181_s20  }
  0x13   :  { %s182_s23 = smov [#allocation6]   ;;  %s141_s27 = scalar_lea.hbm %s236_s1, 256 }
  0x14   :  { %s39_s24 = sshll.u32 %s182_s23, 4  ;;  %p142_p8 = scmp.ne.s32.totalorder %s236_s1, %s141_s27  ;;  %s40_s24 = int_to_ptr.vmem [resolvable:$true] %s39_s24 }
  0x15   :  { %p145_p9 = scmp.lt.u32.totalorder %s141_s27, %s236_s1 }
  0x17   :  { %p147_p10 = pnand %p145_p9, %p142_p8 }
  0x19   :  { %150 = shalt.err (!%p147_p10)
}
  0x1a   :  { %s151_s4 = scalar_lea.vmem %s40_s24, 256  ;;  %p156_p12 = scmp.lt.s32.totalorder %s40_s24, %s40_s24 }
  0x1b   :  { %p152_p11 = scmp.ne.s32.totalorder %s40_s24, %s151_s4  ;;  %p157_p13 = scmp.lt.s32.totalorder %s151_s4, %s151_s4 }
  0x1d   :  { %p158_p0 = por %p157_p13, %p156_p12 }
  0x1f   :  { %p159_p1 = pnand %p158_p0, %p152_p11 }
  0x21   :  { %162 = shalt.err (!%p159_p1)
}
  0x22   :  { %45 = dma.hbm_to_vmem [thread:$0]  %s236_s1, 256, %s40_s24, [#allocation7], %s180_s19, %s180_s19, %s181_s20  }
  0x23   :  { %173 = dma.done.wait [#allocation4], 256  }
  0x24   :  { %174 = vsyncadd [#allocation4], 4294967040 }
  0x25   :  { %175 = dma.done.wait [#allocation7], 256  }
  0x26   :  { %176 = vsyncadd [#allocation7], 4294967040  ;;  %v66_v0 = vld [vmem:[#allocation3] sm:$0xff]  ;;  %v67_v1 = vld [vmem:[#allocation3 + $0x8] sm:$0xff]  ;;  %s163_s9 = scalar_lea.hbm %s237_s2, 16 }
  0x27   :  { %v68_v2 = vld [vmem:[#allocation6] sm:$0xff]  ;;  %v69_v3 = vld [vmem:[#allocation6 + $0x8] sm:$0xff]  ;;  %p164_p2 = scmp.ne.s32.totalorder %s237_s2, %s163_s9  ;;  %p167_p3 = scmp.lt.u32.totalorder %s163_s9, %s237_s2 }
  0x28   :  { %v70_v4 = vsub.f32 %v66_v0, %v68_v2  ;;  %v71_v5 = vsub.f32 %v67_v1, %v69_v3 }
  0x29   :  { %p169_p4 = pnand %p167_p3, %p164_p2 }
  0x2a   :  { %v72_v6 = vand.u32 2147483647, %v70_v4  ;;  %v73_v7 = vand.u32 2147483647, %v71_v5 }
  0x2c   :  { %v74_v8 = vadd.f32 %v73_v7, %v72_v6 }
  0x2e   :  { %81 = vadd.xlane.f32.xlu0 %v74_v8 }
  0xbb   :  { %v82_v9 = vpop.xlane.xlu0 %81 }
  0xbc   :  { %v83_v10 = vrot.slane %v82_v9, 4 }
  0xbe   :  { %v84_v11 = vadd.f32 %v83_v10, %v82_v9 }
  0xc0   :  { %v85_v12 = vrot.slane %v84_v11, 2 }
  0xc2   :  { %v86_v13 = vadd.f32 %v85_v12, %v84_v11 }
  0xc4   :  { %v87_v14 = vrot.slane %v86_v13, 1 }
  0xc6   :  { %v88_v15 = vadd.f32 %v87_v14, %v86_v13 }
  0xc8   :  { %112 = vpush %v88_v15 }
  0xf9   :  { %s113_s1 = spop %112 }
  0xfa   :  { %s90_s6 = smul.f32 0.00048828125, %s113_s1 }
  0xfc   :  { %92 = sst [smem:[#allocation8]] %s90_s6 }
  0xfd   :  { %172 = shalt.err (!%p169_p4)
}
  0xfe   :  { %s183_s14 = smov [#allocation8]  }
  0xff   :  { %100 = dma.smem_to_hbm %s183_s14, 16, %s237_s2, [#allocation5]  }
 0x100   :  { %177 = dma.done.wait [#allocation5], 16  }
 0x101   :  { %178 = vsyncadd [#allocation5], 4294967280 }
 0x102   :  { %104 = sfence }
 0x103   :  { %105 = vsyncpa [#allocation4], 1 }
 0x104   :  { %106 = vsyncpa [#allocation7], 1 }
 0x105   :  { %107 = vsyncpa [#allocation5], 1 }

</bundles_post_ra>
